<compile_context>
chip_gen: v6e
topology: v6e:2x2x1
jax: 0.10.0
libtpu: 0.0.40
codegen_flags: <defaults>
</compile_context>

<pallas_src>
import functools

import jax
import jax.numpy as jnp
import numpy as np
from jax import lax
from jax.experimental import pallas as pl
from jax.experimental.pallas import tpu as pltpu

KH = KW = 4
STRIDE = 2
PAD = 1
EPS = 1e-5
NEG_SLOPE = 0.2


def _fused_conv_in_lrelu_kernel(x_ref, w_ref, o_ref, *, wo, p, normalize):
    # x_ref: (1, 8*Cin, L)   bf16, L = (Ho+1)*Wo, space-to-depth input
    # w_ref: (2, TCo, 8*Cin) bf16, rearranged conv weight (tap-a major)
    # o_ref: (1, TCo, P)     f32,  P = Ho*Wo (spatial axis lane-dense)
    x0 = x_ref[0, :, 0:p]           # (8Cin, P)  row-shift a = 0
    x1 = x_ref[0, :, wo:wo + p]     # (8Cin, P)  row-shift a = 1
    y = jnp.dot(w_ref[0], x0, preferred_element_type=jnp.float32)
    y = y + jnp.dot(w_ref[1], x1, preferred_element_type=jnp.float32)

    if normalize:
        mean = jnp.mean(y, axis=-1, keepdims=True)
        yc = y - mean
        var = jnp.mean(yc * yc, axis=-1, keepdims=True)
        y = yc * lax.rsqrt(var + EPS)
    o_ref[0] = jnp.maximum(y, NEG_SLOPE * y).astype(o_ref.dtype)


def _vmem_budget_bytes():
    """Per-generation physical VMEM -> (vmem_limit, per-step block budget)."""
    cap = 64 * 1024 * 1024                       # conservative (v7x-sized)
    try:
        info = pltpu.get_tpu_info()
        cap = int(getattr(info, "vmem_capacity_bytes", cap)) or cap
    except Exception:
        pass
    limit = min(int(cap * 3 // 4), 96 * 1024 * 1024)   # 48 MiB v7x, 96 MiB v5e/v6e
    return limit, limit - 8 * 1024 * 1024


def _block_vmem_bytes(c_in, tco, l, p):
    """Real VMEM model: double-buffered blocks + largest live values."""
    in_b = 2 * (8 * c_in) * l * 2          # xcat block, bf16, x2 buffers
    w_b = 2 * 2 * tco * (8 * c_in) * 2     # weight block, bf16, x2 buffers
    out_b = 2 * tco * p * 4                # output block, f32, x2 buffers
    live = tco * p * 4 + (8 * c_in) * p * 2  # f32 acc + one bf16 rhs slice
    return in_b + w_b + out_b + live


def _choose_tco(n, c_in, c_out, l, p, budget):
    tco = c_out
    # Shrink the Cout tile until the per-step blocks fit the VMEM budget
    # (keeps tco a multiple of 8 so the BlockSpec stays legal).
    while (_block_vmem_bytes(c_in, tco, l, p) > budget
           and tco % 2 == 0 and (tco // 2) % 8 == 0):
        tco //= 2
    # Give both v7x TensorCores work when the batch alone cannot (N == 1).
    if n * (c_out // tco) == 1 and c_out % 16 == 0:
        tco = c_out // 2
    return tco


def unet_down(x, weight, *, normalize=True):
    """x: (N, Cin, H, W), weight: (Cout, Cin, 4, 4) -> (N, Cout, H/2, W/2)."""
    n, c_in, h, w = x.shape
    c_out = weight.shape[0]
    assert weight.shape == (c_out, c_in, KH, KW)
    assert h % 2 == 0 and w % 2 == 0, "stride-2 space-to-depth needs even H, W"
    ho, wo = h // 2, w // 2
    p = ho * wo                       # output spatial extent (lane axis)
    l = (ho + 1) * wo                 # prepared-input spatial extent
    ck = 8 * c_in                     # per-tap contraction dim (Cin * 2 * 2 * 2)

    # ---- Wrapper-side prep (bf16, ~2x raw input bytes; no 4x im2col) -------
    xb = x.astype(jnp.bfloat16)
    xp = jnp.pad(xb, ((0, 0), (0, 0), (PAD, PAD), (PAD, PAD)))
    # space-to-depth: x_pad[ci, 2i+r, 2j+c] -> xs[ci, r, c, i, j]
    xs = xp.reshape(n, c_in, ho + 1, 2, wo + 1, 2).transpose(0, 1, 3, 5, 2, 4)
    # column shift b in {0,1} folded into channels; flatten (i, j) onto lanes
    xcat = jnp.stack([xs[..., 0:wo], xs[..., 1:wo + 1]], axis=1)
    xcat = xcat.reshape(n, ck, l)     # channel order: (b, ci, r, c)

    # Weight: w[co, ci, 2a+r, 2b+c] -> wr[a, co, (b, ci, r, c)]
    wr = weight.reshape(c_out, c_in, 2, 2, 2, 2)        # [co, ci, a, r, b, c]
    wr = wr.transpose(2, 0, 4, 1, 3, 5).reshape(2, c_out, ck)
    wr = wr.astype(jnp.bfloat16)

    vmem_limit, budget = _vmem_budget_bytes()
    tco = _choose_tco(n, c_in, c_out, l, p, budget)
    assert c_out % tco == 0 and (tco == c_out or tco % 8 == 0)
    n_co = c_out // tco
    # TODO(synk): add a spatially-tiled (resident-output) fallback for
    # activations too large to hold one (8*Cin, L) + (TCo, P) block in VMEM.

    kernel = functools.partial(_fused_conv_in_lrelu_kernel,
                               wo=wo, p=p, normalize=normalize)

    flops = 2 * n * c_out * (2 * ck) * p + 10 * n * c_out * p
    bytes_accessed = xcat.size * 2 + wr.size * 2 + n * c_out * p * 4

    out = pl.pallas_call(
        kernel,
        out_shape=jax.ShapeDtypeStruct((n, c_out, p), jnp.float32),
        grid_spec=pltpu.PrefetchScalarGridSpec(
            num_scalar_prefetch=0,
            grid=(n, n_co),
            in_specs=[
                pl.BlockSpec((1, ck, l), lambda b, co: (b, 0, 0)),
                pl.BlockSpec((2, tco, ck), lambda b, co: (0, co, 0)),
            ],
            out_specs=pl.BlockSpec((1, tco, p), lambda b, co: (b, co, 0)),
        ),
        compiler_params=pltpu.CompilerParams(
            dimension_semantics=("parallel", "parallel"),
            vmem_limit_bytes=vmem_limit),
        cost_estimate=pl.CostEstimate(
            flops=flops, transcendentals=n * c_out,
            bytes_accessed=bytes_accessed),
    )(xcat, wr)

    # (N, Cout, Ho*Wo) -> NCHW with a pure reshape (no transpose needed).
    return out.reshape(n, c_out, ho, wo)


def unet_down_reference(x, weight, *, normalize=True):
    """Plain-JAX f32 reference (conv -> instance norm -> leaky relu)."""
    y = lax.conv_general_dilated(
        x.astype(jnp.float32), weight.astype(jnp.float32),
        window_strides=(STRIDE, STRIDE),
        padding=[(PAD, PAD), (PAD, PAD)],
        dimension_numbers=("NCHW", "OIHW", "NCHW"))
    if normalize:
        mean = jnp.mean(y, axis=(2, 3), keepdims=True)
        var = jnp.mean(jnp.square(y - mean), axis=(2, 3), keepdims=True)
        y = (y - mean) * lax.rsqrt(var + EPS)
    return jnp.where(y >= 0, y, NEG_SLOPE * y)


if __name__ == "__main__":
    in_size, out_size = 4, 8
    N, H, W = 2, 16, 16               # Ho = Wo = 8, P = 64

    key = jax.random.PRNGKey(0)
    kx, kw = jax.random.split(key)
    x = jax.random.normal(kx, (N, in_size, H, W), dtype=jnp.float32)
    weight = jax.random.normal(kw, (out_size, in_size, KH, KW),
                               dtype=jnp.float32) * 0.05

    y = unet_down(x, weight)
    jax.block_until_ready(y)

    y_ref = unet_down_reference(x, weight)
    # bf16 matmul operands vs f32 reference -> loose tolerance (intentional).
    np.testing.assert_allclose(np.asarray(y), np.asarray(y_ref),
                               rtol=2e-2, atol=2e-2)
    assert y.shape == (N, out_size, H // 2, W // 2)

    print("KERNEL_OK")
</pallas_src>

<mosaic_0001>
module attributes {stable_mosaic.version = 11 : i64} {
  func.func @_fused_conv_in_lrelu_kernel(%arg0: i32, %arg1: i32, %arg2: memref<1x32x72xbf16, #tpu.memory_space<vmem>>, %arg3: memref<2x8x32xbf16, #tpu.memory_space<vmem>>, %arg4: memref<1x8x64xf32, #tpu.memory_space<vmem>>) attributes {dimension_semantics = [#tpu.dimension_semantics<parallel>, #tpu.dimension_semantics<parallel>], iteration_bounds = array<i64: 2, 1>, scalar_prefetch = 0 : i64, scratch_operands = 0 : i64, tpu.core_type = #tpu.core_type<tc>, window_params = [{transform_indices = @transform_0, window_bounds = array<i64: 1, 32, 72>}, {transform_indices = @transform_1, window_bounds = array<i64: 2, 8, 32>}, {transform_indices = @transform_2, window_bounds = array<i64: 1, 8, 64>}]} {
    %c0 = arith.constant 0 : index
    %c0_0 = arith.constant 0 : index
    %c0_1 = arith.constant 0 : index
    %0 = vector.load %arg2[%c0, %c0_0, %c0_1] : memref<1x32x72xbf16, #tpu.memory_space<vmem>>, vector<1x32x64xbf16>
    %1 = vector.shape_cast %0 : vector<1x32x64xbf16> to vector<32x64xbf16>
    %c0_2 = arith.constant 0 : index
    %c0_3 = arith.constant 0 : index
    %c8 = arith.constant 8 : index
    %2 = vector.load %arg2[%c0_2, %c0_3, %c8] : memref<1x32x72xbf16, #tpu.memory_space<vmem>>, vector<1x32x64xbf16>
    %3 = vector.shape_cast %2 : vector<1x32x64xbf16> to vector<32x64xbf16>
    %c0_4 = arith.constant 0 : index
    %c0_5 = arith.constant 0 : index
    %c0_6 = arith.constant 0 : index
    %4 = vector.load %arg3[%c0_4, %c0_5, %c0_6] : memref<2x8x32xbf16, #tpu.memory_space<vmem>>, vector<1x8x32xbf16>
    %5 = vector.shape_cast %4 : vector<1x8x32xbf16> to vector<8x32xbf16>
    %cst = arith.constant dense<0.000000e+00> : vector<8x64xf32>
    %6 = tpu.matmul %5, %1, %cst {dimension_numbers = #tpu.dot_dimension_numbers<[1], [0], [0], [1], [0, 0, 1, 1], [], []>} : vector<8x32xbf16>, vector<32x64xbf16>, vector<8x64xf32> -> vector<8x64xf32>
    %c1 = arith.constant 1 : index
    %c0_7 = arith.constant 0 : index
    %c0_8 = arith.constant 0 : index
    %7 = vector.load %arg3[%c1, %c0_7, %c0_8] : memref<2x8x32xbf16, #tpu.memory_space<vmem>>, vector<1x8x32xbf16>
    %8 = vector.shape_cast %7 : vector<1x8x32xbf16> to vector<8x32xbf16>
    %cst_9 = arith.constant dense<0.000000e+00> : vector<8x64xf32>
    %9 = tpu.matmul %8, %3, %cst_9 {dimension_numbers = #tpu.dot_dimension_numbers<[1], [0], [0], [1], [0, 0, 1, 1], [], []>} : vector<8x32xbf16>, vector<32x64xbf16>, vector<8x64xf32> -> vector<8x64xf32>
    %10 = arith.addf %6, %9 : vector<8x64xf32>
    %cst_10 = arith.constant dense<0.000000e+00> : vector<8xf32>
    %11 = vector.multi_reduction <add>, %10, %cst_10 [1] : vector<8x64xf32> to vector<8xf32>
    %12 = vector.shape_cast %11 : vector<8xf32> to vector<8x1xf32>
    %cst_11 = arith.constant 6.400000e+01 : f32
    %13 = vector.broadcast %cst_11 : f32 to vector<8x1xf32>
    %14 = arith.divf %12, %13 : vector<8x1xf32>
    %15 = vector.broadcast %14 : vector<8x1xf32> to vector<8x64xf32>
    %16 = arith.subf %10, %15 : vector<8x64xf32>
    %17 = arith.mulf %16, %16 : vector<8x64xf32>
    %cst_12 = arith.constant dense<0.000000e+00> : vector<8xf32>
    %18 = vector.multi_reduction <add>, %17, %cst_12 [1] : vector<8x64xf32> to vector<8xf32>
    %19 = vector.shape_cast %18 : vector<8xf32> to vector<8x1xf32>
    %cst_13 = arith.constant 6.400000e+01 : f32
    %20 = vector.broadcast %cst_13 : f32 to vector<8x1xf32>
    %21 = arith.divf %19, %20 : vector<8x1xf32>
    %cst_14 = arith.constant 9.99999974E-6 : f32
    %22 = vector.broadcast %cst_14 : f32 to vector<8x1xf32>
    %23 = arith.addf %21, %22 : vector<8x1xf32>
    %24 = math.rsqrt %23 : vector<8x1xf32>
    %25 = vector.broadcast %24 : vector<8x1xf32> to vector<8x64xf32>
    %26 = arith.mulf %16, %25 : vector<8x64xf32>
    %cst_15 = arith.constant 2.000000e-01 : f32
    %27 = vector.broadcast %cst_15 : f32 to vector<8x64xf32>
    %28 = arith.mulf %27, %26 : vector<8x64xf32>
    %29 = arith.maximumf %26, %28 : vector<8x64xf32>
    %c0_16 = arith.constant 0 : index
    %c0_17 = arith.constant 0 : index
    %c0_18 = arith.constant 0 : index
    %30 = vector.load %arg4[%c0_16, %c0_17, %c0_18] : memref<1x8x64xf32, #tpu.memory_space<vmem>>, vector<1x8x64xf32>
    %31 = vector.shape_cast %30 : vector<1x8x64xf32> to vector<8x64xf32>
    %32 = vector.shape_cast %29 : vector<8x64xf32> to vector<1x8x64xf32>
    tpu.vector_store %arg4[%c0_16, %c0_17, %c0_18], %32 {strides = array<i32>} : memref<1x8x64xf32, #tpu.memory_space<vmem>>, vector<1x8x64xf32>,
    return
  }
  func.func @transform_0(%arg0: i32, %arg1: i32) -> (i32, i32, i32) {
    %c0_i32 = arith.constant 0 : i32
    %c0_i32_0 = arith.constant 0 : i32
    %c0_i32_1 = arith.constant 0 : i32
    return %arg0, %c0_i32, %c0_i32_0 : i32, i32, i32
  }
  func.func @transform_1(%arg0: i32, %arg1: i32) -> (i32, i32, i32) {
    %c0_i32 = arith.constant 0 : i32
    %c0_i32_0 = arith.constant 0 : i32
    %c0_i32_1 = arith.constant 0 : i32
    return %c0_i32, %arg1, %c0_i32_0 : i32, i32, i32
  }
  func.func @transform_2(%arg0: i32, %arg1: i32) -> (i32, i32, i32) {
    %c0_i32 = arith.constant 0 : i32
    %c0_i32_0 = arith.constant 0 : i32
    return %arg0, %arg1, %c0_i32 : i32, i32, i32
  }
}

</mosaic_0001>

<bundles_post_ra>
// kernel: tpu_custom_call.1
= control target key start
LH: loop header
LB: loop body
LE: loop exit
PB: predicated region body
PF: predicated region fallthrough
CT: control target
= control target key end

     0   :  { %7 = vsyncpa [#allocation3], 0  ;;  %s900_s0 = inlined_call_operand.hbm [shape: bf16[2,32,72], index: 0, kind: input, shape index: {}]   ;;  %s901_s1 = inlined_call_operand.hbm [shape: bf16[2,8,32], index: 1, kind: input, shape index: {}]   ;;  %s902_s2 = inlined_call_operand.hbm [shape: f32[2,8,64], index: 2, kind: output, shape index: {}]  }
   0x1   :  { %9 = vsyncpa [#allocation3 + $0x1], 0 }
   0x2   :  { %10 = vsyncpa [#allocation6], 0 }
   0x3   :  { %11 = vsyncpa [#allocation4], 0 }
   0x4   :  { %13 = vsyncpa [#allocation4 + $0x1], 0  ;;  %s723_s9 = smov 0   ;;  %s725_s10 = smov 0  }
   0x5   :  { %s727_s11 = smov 0   ;;  %s729_s12 = smov 0  }
   0x6   :  { %s731_s13 = smov 0   ;;  %s733_s14 = smov 0  }
   0x7 LB: > { %s435_s15 = sadd.s32 4294967295, %s698_s14   ;;  %s436_s16 = sadd.s32 4294967294, %s698_s14   ;;  %s698_s14 = sphi %s733_s14, %s19_s14   ;;  %s694_s13 = sphi %s731_s13, %s922_s13   ;;  %s690_s12 = sphi %s729_s12, %s921_s12   ;;  %s686_s11 = sphi %s727_s11, %s920_s11   ;;  %s682_s10 = sphi %s725_s10, %s919_s10   ;;  %s678_s9 = sphi %s723_s9, %s918_s9  }
   0x8   : > { %p51_p0 = scmp.ne.s32.totalorder %s682_s10, %s678_s9  ;;  %p757_p1 = scmp.eq.s32.totalorder %s435_s15, 0 }
   0x9   : > { %p761_p2 = scmp.eq.s32.totalorder %s435_s15, 1  ;;  %p109_p3 = scmp.eq.s32.totalorder %s436_s16, 1 }
   0xa   : > { %p767_p4 = por %p757_p1, %p51_p0  ;;  %p437_p5 = scmp.ge.s32.totalorder %s698_s14, 1 }
   0xb   : > { %p772_p6 = por %p109_p3, %p51_p0  ;;  %p116_p7 = scmp.lt.s32.totalorder %s698_s14, 3 }
   0xc   : > { %s907_s19 = scalar_select %p767_p4, 1, 0 }
   0xd   : > { %s908_s20 = scalar_select %p772_p6, 1, 0 }
   0xe   : > { %p777_p8 = pnand %p437_p5, %p116_p7  ;;  %s700_s22 = smov [#allocation5]  }
   0xf   : > { %s130_s23 = sshll.u32 %s700_s22, 4  ;;  %s31_s25 = sadd.s32 1, %s694_s13  ;;  %s131_s23 = int_to_ptr.vmem [resolvable:$true] %s130_s23 }
  0x10   : > { %p486_p9 = pneg %p777_p8  ;;  %s571_s26 = scalar_lea.vmem %s131_s23, 128 }
  0x11   : > { %p572_p13 = scmp.ne.s32.totalorder %s131_s23, %s571_s26  ;;  %p579_p5 = scmp.lt.s32.totalorder %s131_s23, %s131_s23 }
  0x12   : > { %p786_p11 = pnand %p486_p9, %p757_p1  ;;  %p580_p7 = scmp.lt.s32.totalorder %s571_s26, %s571_s26 }
  0x14   : > { %p562_p12 = pneg %p786_p11  ;;  %p581_p6 = por %p580_p7, %p579_p5 }
  0x16   : > { %p574_p0 = pnand %p572_p13, %p562_p12 }
  0x18   : > { %p575_p3 = pneg %p574_p0 }
  0x1a   : > { %p582_p4 = pnand %p581_p6, %p575_p3 }
  0x1c   : > { %585 = shalt.err (!%p582_p4)
}
  0x1d   : > { %s904_s27 = smov 64   ;;  %s702_s28 = smov 4  }
  0x1e   : > { %489 = dma.hbm_to_vmem [thread:$0]  (!%p786_p11), %s901_s1, 128, %s131_s23, [#allocation6], %s904_s27, %s904_s27, %s702_s28  }
  0x1f   : > { %p33_p4 = scmp.ge.s32.totalorder %s31_s25, 2  ;;  %s38_s3 = sadd.s32 1, %s686_s11 }
  0x20   : > { %p45_p6 = scmp.ne.s32.totalorder %s686_s11, %s682_s10  ;;  %p46_p9 = scmp.eq.s32.totalorder %s698_s14, 0 }
  0x21   : > { %s924_s25 = smov (%p33_p4, %s31_s25), 0  ;;  %p499_p0 = scmp.lt.s32.totalorder %s698_s14, 2 }
  0x22   : > { %p807_p12 = por %p46_p9, %p45_p6  ;;  %p813_p13 = por %p761_p2, %p45_p6 }
  0x23   : > { %s35_s6 = ssub.s32 %s694_s13, %s924_s25  ;;  %s144_s7 = sand.u32 1, %s686_s11  }
  0x24   : > { %p36_p11 = scmp.eq.s32.totalorder %s35_s6, 0  ;;  %s440_s8 = sshll.u32 %s144_s7, 4 }
  0x25   : > { %s455_s16 = sshll.u32 %s694_s13, 8  ;;  %s148_s26 = scalar_lea.vmem [#allocation2], %s440_s8 }
  0x26   : > { %s822_s15 = scalar_select %p36_p11, %s686_s11, %s38_s3  }
  0x27   : > { %s154_s24 = scalar_lea.hbm %s900_s0, %s455_s16  ;;  %s155_s29 = sshll.u32 %s148_s26, 4  ;;  %s156_s29 = int_to_ptr.vmem [resolvable:$true] %s155_s29 }
  0x28   : > { %p830_p2 = pnand %p499_p0, %p807_p12  ;;  %s145_s30 = scalar_lea.sflag [#allocation3], %s144_s7 }
  0x29   : > { %s599_s6 = scalar_lea.vmem %s156_s29, 256  ;;  %s703_s3 = smov [#allocation2]  }
  0x2a   : > { %p588_p3 = pneg %p830_p2  ;;  %p600_p5 = scmp.ne.s32.totalorder %s156_s29, %s599_s6 }
  0x2b   : > { %s604_s27 = sshll.u32 %s703_s3, 4  ;;  %s605_s27 = int_to_ptr.vmem [resolvable:$false] %s604_s27 }
  0x2c   : > { %p602_p7 = pnand %p600_p5, %p588_p3  ;;  %s606_s16 = scalar_lea.vmem %s605_s27, 512 }
  0x2d   : > { %p607_p6 = scmp.lt.s32.totalorder %s156_s29, %s605_s27  ;;  %p608_p9 = scmp.lt.s32.totalorder %s606_s16, %s599_s6 }
  0x2e   : > { %p603_p4 = pneg %p602_p7 }
  0x2f   : > { %p609_p11 = por %p608_p9, %p607_p6 }
  0x31   : > { %p610_p10 = pnand %p609_p11, %p603_p4 }
  0x33   : > { %613 = shalt.err (!%p610_p10)
}
  0x34   : > { %s914_s4 = smov 64   ;;  %167 = sbr.rel (%p777_p8) target bundleno = 701 (0x2bd), region = 28 }
  0x35   : > { %493 = dma.hbm_to_vmem [thread:$0]  (!%p830_p2), %s154_s24, 256, %s156_s29, %s145_s30, %s914_s4, %s914_s4, %s702_s28  }
  0x36   : > { %s844_s7 = sand.u32 (!%p777_p8), 1, %s682_s10   ;;  %p915_p12 = scmp.ne.s32.totalorder (!%p777_p8), %s907_s19, 0 }
  0x37   : > { %s444_s27 = sshll.u32 (!%p777_p8), %s844_s7, 4  ;;  %s170_s8 = scalar_lea.sflag (!%p777_p8), [#allocation3], %s844_s7 }
  0x38   : > { %s173_s22 = scalar_lea.vmem (!%p777_p8), [#allocation2], %s444_s27 }
  0x39   : > { %665 = dma.done.wait (%p915_p12), %s170_s8, 256  }
  0x3a   : > { %667 = vsyncadd (%p915_p12), %s170_s8, 4294967040 }
  0x3b   : > { %669 = dma.done.wait (%p757_p1), [#allocation6], 128  }
  0x3c   : > { %671 = vsyncadd (%p757_p1), [#allocation6], 4294967168  ;;  %v704_v0 = vmov 0.0   ;;  %vm705_vm0 = vmmov 0   ;;  %v556_v1 = vld [vmem:[%s173_s22 + $0x8] sm:$0xff]   ;;  %s706_s21 = smov 120  }
  0x3d   : > { %470 = vmatprep.subr.bf16.mxu1 %v704_v0  ;;  %462 = vmatprep.subr.bf16.mxu0 %v704_v0  ;;  %v557_v2 = vld [vmem:[%s173_s22] sm:$0xff]   ;;  %vm222_vm1 = vcmask 261120   ;;  %vm311_vm2 = vcmask 523264   ;;  %s446_s17 = sshll.u32 %s844_s7, 3  ;;  %s452_s19 = sshll.u32 %s690_s12, 7 }
  0x3e   : > { %474 = vmatprep.mubr.msk.bf16.mxu1 %vm705_vm0, %v704_v0  ;;  %466 = vmatprep.mubr.msk.bf16.mxu0 %vm705_vm0, %v704_v0  ;;  %v203_v3 = vld [vmem:[#allocation5] sm:$0xf]  ;;  %v205_v6 = vld [vmem:[#allocation5 + $0x4] sm:$0xf]  ;;  %s197_s28 = scalar_lea.vmem [#allocation7], %s446_s17  ;;  %s342_s29 = scalar_lea.hbm %s902_s2, %s452_s19 }
  0x3f   : > { %218 = vrot.lane.b32.xlu0 %v556_v1, %s706_s21  ;;  %471 = vmatpush3.bf16.msra.mxu1 %v556_v1  ;;  %s344_s23 = sshll.u32 %s197_s28, 4  ;;  %s330_s18 = scalar_lea.sflag [#allocation4], %s844_s7  ;;  %s345_s23 = int_to_ptr.vmem [resolvable:$true] %s344_s23 }
  0x40   : > { %472 = vmatprep.subr.bf16.mxu1 %v704_v0  ;;  %s614_s30 = scalar_lea.vmem %s345_s23, 128  ;;  %s707_s6 = smov [#allocation7]  }
  0x41   : > { %p615_p1 = scmp.ne.s32.totalorder %s345_s23, %s614_s30  ;;  %s618_s3 = sshll.u32 %s707_s6, 4  ;;  %s619_s3 = int_to_ptr.vmem [resolvable:$false] %s618_s3 }
  0x42   : > { %s620_s12 = scalar_lea.vmem %s619_s3, 256  ;;  %p621_p0 = scmp.lt.s32.totalorder %s345_s23, %s619_s3 }
  0x43   : > { %216 = vrot.lane.b32.xlu0 %v557_v2, %s706_s21  ;;  %473 = vmatpush3.bf16.msra.mxu1 %v557_v2  ;;  %p616_p8 = pnand %p615_p1, %p813_p13  ;;  %p622_p2 = scmp.lt.s32.totalorder %s620_s12, %s614_s30 }
  0x45   : > { %p617_p10 = pneg %p616_p8  ;;  %p623_p3 = por %p622_p2, %p621_p0 }
  0x46   : > { %475 = vmatmul.mubr.msk.bf16.vlgmr.msra.gmra.mxu1 %vm222_vm1, %v203_v3 }
  0x47   : > { %p624_p5 = pnand %p623_p3, %p617_p10 }
  0xb1   : > { %v219_v4 = vpop.permute.xlu0 %218 }
  0xb2   : > { %463 = vmatpush3.bf16.msra.mxu0 %v219_v4 }
  0xb3   : > { %464 = vmatprep.subr.bf16.mxu0 %v704_v0 }
  0xb5   : > { %v217_v5 = vpop.permute.xlu0 %216 }
  0xb6   : > { %465 = vmatpush3.bf16.msra.mxu0 %v217_v5 }
  0xb9   : > { %467 = vmatmul.mubr.msk.bf16.vlgmr.msra.gmra.mxu0 %vm222_vm1, %v205_v6 }
 0x106   : > { %v305_v7 = vpop.f32.mrf.mxu1 }
 0x108   : > { %v476_v8 = vpop.f32.mrf.mxu1 }
 0x10a   : > { %v308_v9 = vpop.f32.mrf.mxu1 }
 0x10c   : > { %v477_v10 = vpop.f32.mrf.mxu1 }
 0x179   : > { %v260_v11 = vpop.f32.mrf.mxu0 }
 0x17a   : > { %v306_v12 = vadd.f32 %v305_v7, %v260_v11 }
 0x17b   : > { %v468_v13 = vpop.f32.mrf.mxu0 }
 0x17c   : > { %v312_v14 = vsel %vm311_vm2, %v306_v12, 0.0 }
 0x17d   : > { %v263_v15 = vpop.f32.mrf.mxu0  ;;  %313 = vadd.xlane.f32.xlu1 %v312_v14 }
 0x17f   : > { %v469_v16 = vpop.f32.mrf.mxu0 }
 0x206   : > { %v314_v17 = vpop.xlane.xlu1 %313 }
 0x207   : > { %v316_v18 = vmul.f32 0.015625, %v314_v17 }
 0x209   : > { %v317_v19 = vsub.f32 %v306_v12, %v316_v18 }
 0x20b   : > { %v318_v20 = vmul.f32 %v317_v19, %v317_v19 }
 0x20d   : > { %v319_v21 = vsel %vm311_vm2, %v318_v20, 0.0 }
 0x20e   : > { %320 = vadd.xlane.f32.xlu1 %v319_v21 }
 0x297   : > { %v321_v22 = vpop.xlane.xlu1 %320 }
 0x298   : > { %v322_v23 = vmul.f32 0.015625, %v321_v22 }
 0x29a   : > { %v323_v24 = vadd.f32 1e-05, %v322_v23 }
 0x29c   : > { %558 = vrsqrt.f32 %v323_v24 }
 0x2a9   : > { %v559_v25 = vpop.eup %558 }
 0x2aa   : > { %v325_v26 = vmul.f32 %v559_v25, %v317_v19 }
 0x2ac   : > { %v326_v27 = vmul.f32 0.2, %v325_v26 }
 0x2ae   : > { %v327_v28 = vmax.f32 %v325_v26, %v326_v27 }
 0x2b0   : > { %328 = vst.msk [vmem:[%s197_s28] sm:$0xff] %vm311_vm2, %v327_v28 }
 0x2b1   : > { %627 = shalt.err (!%p624_p5)
}
 0x2b2   : > { %s628_s16 = scalar_lea.hbm %s342_s29, 128  ;;  %s632_s27 = scalar_lea.hbm %s902_s2, 256 }
 0x2b3   : > { %p629_p7 = scmp.ne.s32.totalorder %s342_s29, %s628_s16  ;;  %p633_p9 = scmp.lt.s32.totalorder %s342_s29, %s902_s2 }
 0x2b4   : > { %p634_p11 = scmp.lt.s32.totalorder %s632_s27, %s628_s16 }
 0x2b5   : > { %p630_p4 = pnand %p629_p7, %p813_p13 }
 0x2b6   : > { %p635_p12 = por %p634_p11, %p633_p9 }
 0x2b7   : > { %p631_p6 = pneg %p630_p4 }
 0x2b9   : > { %p636_p1 = pnand %p635_p12, %p631_p6 }
 0x2bb   : > { %639 = shalt.err (!%p636_p1)
}
 0x2bc   : > { %484 = dma.vmem_to_hbm [thread:$0]  (%p813_p13), %s345_s23, 128, %s342_s29, %s330_s18  }
 0x2bd PF: > { %s356_s21 = sand.u32 1, %s678_s9   ;;  %p916_p8 = scmp.ne.s32.totalorder %s908_s20, 0 }
 0x2be   : > { %p917_p10 = scmp.ge.s32.totalorder %s698_s14, 2  ;;  %s357_s17 = scalar_lea.sflag [#allocation4], %s356_s21 }
 0x2c0   : > { %p495_p0 = pnand %p917_p10, %p916_p8 }
 0x2c2   : > { %p496_p2 = pneg %p495_p0 }
 0x2c4   : > { %673 = dma.done.wait (%p496_p2), %s357_s17, 128  }
 0x2c5   : > { %675 = vsyncadd (%p496_p2), %s357_s17, 4294967168  ;;  %s19_s14 = sadd.s32 1, %s698_s14   ;;  %s918_s9 = smov %s682_s10 }
 0x2c6   : > { %p16_p3 = scmp.ge.s32.totalorder %s19_s14, 4   ;;  %s919_s10 = smov %s686_s11 }
 0x2c7   : > { %s920_s11 = smov %s822_s15  ;;  %s921_s12 = smov %s694_s13 }
 0x2c8   : > { %s922_s13 = smov %s924_s25  ;;  %18 = sbr.rel (!%p16_p3) target bundleno = 7 (0x7), region = 79 }
 0x2cd   :  { %362 = vsyncpa [#allocation3], 1 }
 0x2ce   :  { %364 = vsyncpa [#allocation3 + $0x1], 1 }
 0x2cf   :  { %365 = vsyncpa [#allocation6], 1 }
 0x2d0   :  { %366 = vsyncpa [#allocation4], 1 }
 0x2d1   :  { %368 = vsyncpa [#allocation4 + $0x1], 1 }

</bundles_post_ra>
